<compile_context>
chip_gen: v5e
topology: v5e:2x2
jax: 0.10.0
libtpu: 0.0.40
codegen_flags: <defaults>
</compile_context>

<pallas_src>
import functools
import math

import jax
import jax.numpy as jnp
from jax import lax
from jax.experimental import pallas as pl
from jax.experimental.pallas import tpu as pltpu

LANES = 128            # vreg lane width
MAX_BLOCK_ROWS = 4096  # (4096,128) f32 = 2 MiB per input buffer
GROUP_ROWS = 512       # rows per in-kernel accumulation chunk


def _cdiv(a, b):
    return -(-a // b)


def _round_up(x, m):
    return _cdiv(x, m) * m


def _sublane_align(dtype):
    size = dtype.itemsize
    if size >= 4:
        return 8
    if size == 2:
        return 16
    return 32   # int8 / uint8 / fp8


def _choose_block_rows(rows, row_align):
    """Biggest aligned block, but aim for >=2 blocks so both v7x TCs get work."""
    half = _cdiv(rows, 2)
    br = _round_up(max(half, 1), row_align)
    if br > GROUP_ROWS:
        br = _round_up(br, GROUP_ROWS)   # so GROUP_ROWS divides block_rows
    return max(min(br, MAX_BLOCK_ROWS), row_align)


def _wbce_partials_kernel(x_ref, y_ref, out_ref, *, block_rows, group_rows,
                          num_blocks, n_valid, tail_groups, needs_mask):
    """Write this block's (3, 8, 128) lane-partial sums of (A, B, sum_y)."""
    pid = pl.program_id(0)
    n_groups = block_rows // group_rows
    full_rows = n_valid // LANES          # rows with all 128 lanes valid
    rem_lanes = n_valid % LANES           # valid lanes in row `full_rows`

    def softplus_neg(x):
        # numerically stable softplus(-x) = max(-x,0) + log1p(exp(-|x|))
        return jnp.maximum(-x, 0.0) + jnp.log1p(jnp.exp(-jnp.abs(x)))

    def fold(v):
        # (group_rows, 128) -> (8, 128): tile-aligned VPU adds only; the final
        # cross-lane reduce is deferred to a tiny XLA epilogue.
        return jnp.sum(v.reshape(group_rows // 8, 8, LANES), axis=0)

    def load(g):
        r0 = pl.multiple_of(g * group_rows, group_rows)
        x = x_ref[pl.ds(r0, group_rows), :].astype(jnp.float32)
        y = y_ref[pl.ds(r0, group_rows), :].astype(jnp.float32)
        return x, y

    def body_fast(g, carry):
        a_acc, b_acc, y_acc = carry
        x, y = load(g)
        s = softplus_neg(x)
        a_acc = a_acc + fold((1.0 - y) * (x + s))
        b_acc = b_acc + fold(y * s)
        y_acc = y_acc + fold(y)
        return a_acc, b_acc, y_acc

    def body_masked(g, carry):
        a_acc, b_acc, y_acc = carry
        x, y = load(g)
        base = pid * block_rows + g * group_rows
        row = base + lax.broadcasted_iota(jnp.int32, (group_rows, LANES), 0)
        lane = lax.broadcasted_iota(jnp.int32, (group_rows, LANES), 1)
        valid = (row < full_rows) | ((row == full_rows) & (lane < rem_lanes))
        # Mask BEFORE the transcendentals: the ragged tail of the last block
        # holds stale VMEM garbage, and 0 * NaN would poison the partials.
        x = jnp.where(valid, x, 0.0)
        y = jnp.where(valid, y, 0.0)
        s = softplus_neg(x)
        a_acc = a_acc + fold(valid.astype(jnp.float32) * ((1.0 - y) * (x + s)))
        b_acc = b_acc + fold(y * s)      # y is already zero on invalid elems
        y_acc = y_acc + fold(y)
        return a_acc, b_acc, y_acc

    init = (jnp.zeros((8, LANES), jnp.float32),
            jnp.zeros((8, LANES), jnp.float32),
            jnp.zeros((8, LANES), jnp.float32))

    def run(body, count):
        if count == 1:
            return body(jnp.int32(0), init)
        return lax.fori_loop(0, count, body, init)

    def emit(a, b, ysum):
        out_ref[0, 0] = a
        out_ref[0, 1] = b
        out_ref[0, 2] = ysum

    if not needs_mask:
        emit(*run(body_fast, n_groups))
    else:
        if num_blocks > 1:
            @pl.when(pid != num_blocks - 1)
            def _():
                emit(*run(body_fast, n_groups))

        @pl.when(pid == num_blocks - 1)
        def _():
            emit(*run(body_masked, tail_groups))


def _partial_sums(x_slab, y_slab, n_valid, block_rows, group_rows):
    """x_slab, y_slab: (R, 128) slabs (native dtypes). Returns (A, B, sum_y)."""
    rows_padded = x_slab.shape[0]
    nblk = _cdiv(rows_padded, block_rows)
    needs_mask = (nblk * block_rows * LANES != n_valid)
    rows_data = _cdiv(n_valid, LANES)                       # rows holding data
    tail_rows = rows_data - (nblk - 1) * block_rows         # >= 1 by construction
    tail_groups = max(1, _cdiv(tail_rows, group_rows))

    kernel = functools.partial(
        _wbce_partials_kernel, block_rows=block_rows, group_rows=group_rows,
        num_blocks=nblk, n_valid=n_valid, tail_groups=tail_groups,
        needs_mask=needs_mask)

    # Explicit VMEM budget: double-buffered inputs/outputs + headroom for the
    # group-sized in-kernel temporaries.
    x_bytes = block_rows * LANES * x_slab.dtype.itemsize
    y_bytes = block_rows * LANES * y_slab.dtype.itemsize
    out_bytes = 3 * 8 * LANES * 4
    vmem_limit = int(2 * (x_bytes + y_bytes + out_bytes) + (8 << 20))

    partials = pl.pallas_call(
        kernel,
        out_shape=jax.ShapeDtypeStruct((nblk, 3, 8, LANES), jnp.float32),
        grid=(nblk,),
        in_specs=[
            pl.BlockSpec((block_rows, LANES), lambda i: (i, 0)),
            pl.BlockSpec((block_rows, LANES), lambda i: (i, 0)),
        ],
        out_specs=pl.BlockSpec((1, 3, 8, LANES), lambda i: (i, 0, 0, 0)),
        compiler_params=pltpu.CompilerParams(
            dimension_semantics=("parallel",),       # megacore split on v7x
            vmem_limit_bytes=vmem_limit),
    )(x_slab, y_slab)
    totals = jnp.sum(partials, axis=(0, 2, 3))       # tiny epilogue reduce
    return totals[0], totals[1], totals[2]


def weighted_bce_with_logits_loss(logits, target, reduction="mean"):
    """JAX/Pallas equivalent of WeightedBCEWithLogitsLoss.forward."""
    assert logits.shape == target.shape
    n = math.prod(logits.shape)
    assert n > 0

    x = logits
    y = target
    # Keep native dtypes in HBM (no wrapper-side f32 promotion); bool targets
    # become int8 (1 byte) and are cast to f32 inside the kernel.
    if x.dtype == jnp.bool_:
        x = x.astype(jnp.float32)
    if y.dtype == jnp.bool_:
        y = y.astype(jnp.int8)

    row_align = max(_sublane_align(x.dtype), _sublane_align(y.dtype))
    rows = _cdiv(n, LANES)
    block_rows = _choose_block_rows(rows, row_align)
    group_rows = min(GROUP_ROWS, block_rows)

    if n % LANES == 0 and rows >= block_rows:
        rows_padded = rows                      # zero-copy: reshape only
    else:
        # Rare tail pad: only to the next aligned row, never to a full block.
        rows_padded = _round_up(max(rows, block_rows), row_align)

    def to_slab(a):
        flat = a.reshape(-1)
        pad = rows_padded * LANES - n
        if pad:
            flat = jnp.pad(flat, (0, pad))
        return flat.reshape(rows_padded, LANES)

    a_sum, b_sum, pos_sum = _partial_sums(
        to_slab(x), to_slab(y), n, block_rows, group_rows)

    eps = jnp.float32(1e-10)
    n_f = jnp.float32(n)
    pos_num = pos_sum + eps
    neg_num = (n_f - pos_sum) + eps
    alpha = neg_num / pos_num                 # pos_weight
    beta = pos_num / (pos_num + neg_num)

    loss_sum = a_sum + alpha * b_sum          # sum of per-element BCE-with-logits
    if reduction == "mean":
        bce = loss_sum / n_f
    elif reduction == "sum":
        bce = loss_sum
    else:
        # TODO(synk): reduction='none' (per-element map) is not implemented in
        # the fused-reduction kernel.
        raise ValueError(f"unsupported reduction: {reduction}")
    return beta * bce


def _reference(logits, target, reduction="mean"):
    """Pure-JAX reference mirroring the PyTorch module."""
    eps = 1e-10
    x = logits.astype(jnp.float32)
    y = target.astype(jnp.float32)
    pos_num = jnp.sum(y) + eps
    neg_num = jnp.sum(1.0 - y) + eps
    alpha = neg_num / pos_num
    beta = pos_num / (pos_num + neg_num)
    s = jnp.maximum(-x, 0.0) + jnp.log1p(jnp.exp(-jnp.abs(x)))
    per_elem = (1.0 - y) * (x + s) + alpha * y * s
    bce = jnp.mean(per_elem) if reduction == "mean" else jnp.sum(per_elem)
    return beta * bce


if __name__ == "__main__":
    key = jax.random.PRNGKey(0)

    cases = [
        ((2, 4, 16, 16), jnp.float32),   # exact multiple: unmasked fast path
        ((1, 1, 30, 30), jnp.float32),   # n % 128 != 0: minimal pad + mask
        ((2, 4, 32, 33), jnp.int8),      # ragged last block + int8 target
    ]
    for idx, (shape, tdtype) in enumerate(cases):
        k1, k2 = jax.random.split(jax.random.fold_in(key, idx))
        logits = jax.random.normal(k1, shape, dtype=jnp.float32) * 2.0
        target = (jax.random.uniform(k2, shape) > 0.7).astype(tdtype)

        loss = weighted_bce_with_logits_loss(logits, target, reduction="mean")
        loss = jax.block_until_ready(loss)

        ref = _reference(logits, target, reduction="mean")
        assert jnp.allclose(loss, ref, rtol=1e-4, atol=1e-5), (shape, loss, ref)

    print("KERNEL_OK")
</pallas_src>

<mosaic_0001>
module attributes {stable_mosaic.version = 11 : i64} {
  func.func @_wbce_partials_kernel(%arg0: i32, %arg1: memref<8x128xf32, #tpu.memory_space<vmem>>, %arg2: memref<8x128xf32, #tpu.memory_space<vmem>>, %arg3: memref<1x3x8x128xf32, #tpu.memory_space<vmem>>) attributes {dimension_semantics = [#tpu.dimension_semantics<parallel>], iteration_bounds = array<i64: 2>, scalar_prefetch = 0 : i64, scratch_operands = 0 : i64, tpu.core_type = #tpu.core_type<tc>, window_params = [{transform_indices = @transform_0, window_bounds = array<i64: 8, 128>}, {transform_indices = @transform_1, window_bounds = array<i64: 8, 128>}, {transform_indices = @transform_2, window_bounds = array<i64: 1, 3, 8, 128>}]} {
    %cst = arith.constant 0.000000e+00 : f32
    %0 = vector.broadcast %cst : f32 to vector<8x128xf32>
    %cst_0 = arith.constant 0.000000e+00 : f32
    %1 = vector.broadcast %cst_0 : f32 to vector<8x128xf32>
    %cst_1 = arith.constant 0.000000e+00 : f32
    %2 = vector.broadcast %cst_1 : f32 to vector<8x128xf32>
    %c0_i32 = arith.constant 0 : i32
    %c8_i32 = arith.constant 8 : i32
    %3 = arith.muli %c0_i32, %c8_i32 : i32
    %4 = tpu.assume_multiple %3, 8 : i32
    %5 = arith.index_cast %4 : i32 to index
    %c0 = arith.constant 0 : index
    %6 = vector.load %arg1[%5, %c0] : memref<8x128xf32, #tpu.memory_space<vmem>>, vector<8x128xf32>
    %7 = arith.index_cast %4 : i32 to index
    %c0_2 = arith.constant 0 : index
    %8 = vector.load %arg2[%7, %c0_2] : memref<8x128xf32, #tpu.memory_space<vmem>>, vector<8x128xf32>
    %cst_3 = arith.constant 0.000000e+00 : f32
    %9 = vector.broadcast %cst_3 : f32 to vector<8x128xf32>
    %10 = arith.subf %9, %6 : vector<8x128xf32>
    %cst_4 = arith.constant 0.000000e+00 : f32
    %11 = vector.broadcast %cst_4 : f32 to vector<8x128xf32>
    %12 = arith.maximumf %10, %11 : vector<8x128xf32>
    %13 = math.absf %6 : vector<8x128xf32>
    %cst_5 = arith.constant 0.000000e+00 : f32
    %14 = vector.broadcast %cst_5 : f32 to vector<8x128xf32>
    %15 = arith.subf %14, %13 : vector<8x128xf32>
    %16 = math.exp %15 : vector<8x128xf32>
    %17 = math.log1p %16 : vector<8x128xf32>
    %18 = arith.addf %12, %17 : vector<8x128xf32>
    %cst_6 = arith.constant 1.000000e+00 : f32
    %19 = vector.broadcast %cst_6 : f32 to vector<8x128xf32>
    %20 = arith.subf %19, %8 : vector<8x128xf32>
    %21 = arith.addf %6, %18 : vector<8x128xf32>
    %22 = arith.mulf %20, %21 : vector<8x128xf32>
    %23 = vector.shape_cast %22 : vector<8x128xf32> to vector<1x8x128xf32>
    %cst_7 = arith.constant dense<0.000000e+00> : vector<8x128xf32>
    %24 = vector.multi_reduction <add>, %23, %cst_7 [0] : vector<1x8x128xf32> to vector<8x128xf32>
    %25 = arith.addf %0, %24 : vector<8x128xf32>
    %26 = arith.mulf %8, %18 : vector<8x128xf32>
    %27 = vector.shape_cast %26 : vector<8x128xf32> to vector<1x8x128xf32>
    %cst_8 = arith.constant dense<0.000000e+00> : vector<8x128xf32>
    %28 = vector.multi_reduction <add>, %27, %cst_8 [0] : vector<1x8x128xf32> to vector<8x128xf32>
    %29 = arith.addf %1, %28 : vector<8x128xf32>
    %30 = vector.shape_cast %8 : vector<8x128xf32> to vector<1x8x128xf32>
    %cst_9 = arith.constant dense<0.000000e+00> : vector<8x128xf32>
    %31 = vector.multi_reduction <add>, %30, %cst_9 [0] : vector<1x8x128xf32> to vector<8x128xf32>
    %32 = arith.addf %2, %31 : vector<8x128xf32>
    %c0_10 = arith.constant 0 : index
    %c0_11 = arith.constant 0 : index
    %c0_12 = arith.constant 0 : index
    %c0_13 = arith.constant 0 : index
    %33 = vector.load %arg3[%c0_10, %c0_11, %c0_12, %c0_13] : memref<1x3x8x128xf32, #tpu.memory_space<vmem>>, vector<1x1x8x128xf32>
    %34 = vector.shape_cast %33 : vector<1x1x8x128xf32> to vector<8x128xf32>
    %35 = vector.shape_cast %25 : vector<8x128xf32> to vector<1x1x8x128xf32>
    tpu.vector_store %arg3[%c0_10, %c0_11, %c0_12, %c0_13], %35 {strides = array<i32>} : memref<1x3x8x128xf32, #tpu.memory_space<vmem>>, vector<1x1x8x128xf32>,
    %c0_14 = arith.constant 0 : index
    %c1 = arith.constant 1 : index
    %c0_15 = arith.constant 0 : index
    %c0_16 = arith.constant 0 : index
    %36 = vector.load %arg3[%c0_14, %c1, %c0_15, %c0_16] : memref<1x3x8x128xf32, #tpu.memory_space<vmem>>, vector<1x1x8x128xf32>
    %37 = vector.shape_cast %36 : vector<1x1x8x128xf32> to vector<8x128xf32>
    %38 = vector.shape_cast %29 : vector<8x128xf32> to vector<1x1x8x128xf32>
    tpu.vector_store %arg3[%c0_14, %c1, %c0_15, %c0_16], %38 {strides = array<i32>} : memref<1x3x8x128xf32, #tpu.memory_space<vmem>>, vector<1x1x8x128xf32>,
    %c0_17 = arith.constant 0 : index
    %c2 = arith.constant 2 : index
    %c0_18 = arith.constant 0 : index
    %c0_19 = arith.constant 0 : index
    %39 = vector.load %arg3[%c0_17, %c2, %c0_18, %c0_19] : memref<1x3x8x128xf32, #tpu.memory_space<vmem>>, vector<1x1x8x128xf32>
    %40 = vector.shape_cast %39 : vector<1x1x8x128xf32> to vector<8x128xf32>
    %41 = vector.shape_cast %32 : vector<8x128xf32> to vector<1x1x8x128xf32>
    tpu.vector_store %arg3[%c0_17, %c2, %c0_18, %c0_19], %41 {strides = array<i32>} : memref<1x3x8x128xf32, #tpu.memory_space<vmem>>, vector<1x1x8x128xf32>,
    return
  }
  func.func @transform_0(%arg0: i32) -> (i32, i32) {
    %c0_i32 = arith.constant 0 : i32
    %c0_i32_0 = arith.constant 0 : i32
    return %arg0, %c0_i32 : i32, i32
  }
  func.func @transform_1(%arg0: i32) -> (i32, i32) {
    %c0_i32 = arith.constant 0 : i32
    %c0_i32_0 = arith.constant 0 : i32
    return %arg0, %c0_i32 : i32, i32
  }
  func.func @transform_2(%arg0: i32) -> (i32, i32, i32, i32) {
    %c0_i32 = arith.constant 0 : i32
    %c0_i32_0 = arith.constant 0 : i32
    %c0_i32_1 = arith.constant 0 : i32
    %c0_i32_2 = arith.constant 0 : i32
    return %arg0, %c0_i32, %c0_i32_0, %c0_i32_1 : i32, i32, i32, i32
  }
}

</mosaic_0001>

<bundles_post_ra>
// kernel: tpu_custom_call.1
= control target key start
LH: loop header
LB: loop body
LE: loop exit
PB: predicated region body
PF: predicated region fallthrough
CT: control target
= control target key end

     0   :  { %7 = vsyncpa [#allocation3], 0  ;;  %s735_s0 = inlined_call_operand.hbm [shape: f32[16,128], index: 0, kind: input, shape index: {}]   ;;  %s736_s1 = inlined_call_operand.hbm [shape: f32[16,128], index: 1, kind: input, shape index: {}]   ;;  %s737_s2 = inlined_call_operand.hbm [shape: f32[2,3,8,128], index: 2, kind: output, shape index: {}]  }
   0x1   :  { %9 = vsyncpa [#allocation3 + $0x1], 0 }
   0x2   :  { %10 = vsyncpa [#allocation6], 0 }
   0x3   :  { %12 = vsyncpa [#allocation6 + $0x1], 0 }
   0x4   :  { %13 = vsyncpa [#allocation4], 0 }
   0x5   :  { %15 = vsyncpa [#allocation4 + $0x1], 0  ;;  %s568_s9 = smov 0   ;;  %s570_s10 = smov 0  }
   0x6   :  { %s572_s11 = smov 0   ;;  %s574_s12 = smov 0  }
   0x7 LB: > { %s589_s13 = sadd.s32 4294967295, %s549_s12   ;;  %s345_s14 = sadd.s32 4294967294, %s549_s12   ;;  %s549_s12 = sphi %s574_s12, %s748_s12   ;;  %s545_s11 = sphi %s572_s11, %s747_s11   ;;  %s541_s10 = sphi %s570_s10, %s746_s10   ;;  %s537_s9 = sphi %s568_s9, %s745_s9  }
   0x8   : > { %s593_s15 = sadd.s32 1, %s549_s12   ;;  %s28_s16 = sadd.s32 1, %s545_s11 }
   0x9   : > { %s25_s17 = ssub.s32 %s549_s12, %s593_s15  ;;  %p35_p0 = scmp.ne.s32.totalorder %s545_s11, %s541_s10 }
   0xa   : > { %p26_p1 = scmp.eq.s32.totalorder %s25_s17, 0  ;;  %p36_p2 = scmp.eq.s32.totalorder %s549_s12, 0 }
   0xb   : > { %p41_p3 = scmp.ne.s32.totalorder %s541_s10, %s537_s9  ;;  %p42_p4 = scmp.eq.s32.totalorder %s589_s13, 0 }
   0xc   : > { %s605_s18 = scalar_select %p26_p1, %s545_s11, %s28_s16  }
   0xd   : > { %p607_p5 = por %p36_p2, %p35_p0  ;;  %p611_p6 = por %p42_p4, %p41_p3 }
   0xe   : > { %p91_p7 = scmp.eq.s32.totalorder %s589_s13, 1  ;;  %p97_p8 = scmp.eq.s32.totalorder %s345_s14, 1 }
   0xf   : > { %p379_p10 = scmp.lt.s32.totalorder %s549_s12, 2  ;;  %s627_s23 = sand.u32 1, %s545_s11  }
  0x10   : > { %p618_p11 = por %p91_p7, %p35_p0  ;;  %p622_p12 = por %p97_p8, %p41_p3 }
  0x11   : > { %s349_s24 = sshll.u32 %s549_s12, 3  ;;  %s348_s25 = sshll.u32 %s627_s23, 3 }
  0x12   : > { %s125_s28 = scalar_lea.hbm %s735_s0, %s349_s24  ;;  %s121_s30 = scalar_lea.vmem [#allocation2], %s348_s25 }
  0x13   : > { %s127_s29 = sshll.u32 %s125_s28, 4  ;;  %s129_s3 = sshll.u32 %s121_s30, 4  ;;  %s128_s29 = int_to_ptr.hbm [resolvable:$true] %s127_s29  ;;  %s130_s3 = int_to_ptr.vmem [resolvable:$true] %s129_s3 }
  0x14   : > { %p636_p13 = pnand %p379_p10, %p607_p5  ;;  %p352_p0 = scmp.ge.s32.totalorder %s549_s12, 1 }
  0x15   : > { %p153_p1 = scmp.lt.s32.totalorder %s549_s12, 3  ;;  %s118_s5 = scalar_lea.sflag [#allocation3], %s627_s23 }
  0x16   : > { %s419_s6 = sshra.s32 %s128_s29, 4  ;;  %p423_p3 = pneg %p636_p13  ;;  %s420_s6 = int_to_ptr.hbm [resolvable:$true] %s419_s6 }
  0x17   : > { %s421_s7 = scalar_lea.hbm %s420_s6, 8  ;;  %s426_s16 = scalar_lea.hbm %s735_s0, 16 }
  0x18   : > { %p422_p2 = scmp.ne.s32.totalorder %s420_s6, %s421_s7  ;;  %p427_p5 = scmp.lt.s32.totalorder %s420_s6, %s735_s0 }
  0x19   : > { %p428_p8 = scmp.lt.s32.totalorder %s426_s16, %s421_s7 }
  0x1a   : > { %p424_p4 = pnand %p423_p3, %p422_p2 }
  0x1b   : > { %p429_p10 = por %p428_p8, %p427_p5 }
  0x1c   : > { %p425_p7 = pneg %p424_p4 }
  0x1e   : > { %p430_p9 = pnand %p429_p10, %p425_p7 }
  0x20   : > { %433 = shalt.err (!%p430_p9)
}
  0x21   : > { %371 = dma.hbm_to_vmem [thread:$0]  (!%p636_p13), %s128_s29, 128, %s130_s3, %s118_s5  }
  0x22   : > { %p660_p2 = pnand %p352_p0, %p153_p1  ;;  %s144_s30 = scalar_lea.hbm %s736_s1, %s349_s24 }
  0x23   : > { %s146_s6 = sshll.u32 %s144_s30, 4  ;;  %s140_s7 = scalar_lea.vmem [#allocation5], %s348_s25  ;;  %s147_s6 = int_to_ptr.hbm [resolvable:$true] %s146_s6 }
  0x24   : > { %s148_s8 = sshll.u32 %s140_s7, 4  ;;  %s137_s14 = scalar_lea.sflag [#allocation6], %s627_s23  ;;  %s149_s8 = int_to_ptr.vmem [resolvable:$true] %s148_s8 }
  0x25   : > { %s449_s16 = sshra.s32 %s147_s6, 4  ;;  %s456_s5 = scalar_lea.hbm %s736_s1, 16  ;;  %s450_s16 = int_to_ptr.hbm [resolvable:$true] %s449_s16 }
  0x26   : > { %s451_s17 = scalar_lea.hbm %s450_s16, 8  ;;  %p457_p4 = scmp.lt.s32.totalorder %s450_s16, %s736_s1 }
  0x27   : > { %p452_p9 = scmp.ne.s32.totalorder %s450_s16, %s451_s17  ;;  %p458_p7 = scmp.lt.s32.totalorder %s456_s5, %s451_s17 }
  0x29   : > { %p454_p0 = pnand %p452_p9, %p423_p3  ;;  %p459_p5 = por %p458_p7, %p457_p4 }
  0x2b   : > { %p455_p1 = pneg %p454_p0 }
  0x2d   : > { %p460_p8 = pnand %p459_p5, %p455_p1 }
  0x2f   : > { %463 = shalt.err (!%p460_p8)
}
  0x30   : > { %374 = dma.hbm_to_vmem [thread:$0]  (!%p636_p13), %s147_s6, 128, %s149_s8, %s137_s14  }
  0x31   : > { %157 = sbr.rel (%p660_p2) target bundleno = 93 (0x5d), region = 28  ;;  %s682_s23 = sand.u32 (!%p660_p2), 1, %s541_s10  }
  0x32   : > { %s353_s25 = sshll.u32 (!%p660_p2), %s682_s23, 3  ;;  %s160_s27 = scalar_lea.sflag (!%p660_p2), [#allocation3], %s682_s23 }
  0x33   : > { %s163_s28 = scalar_lea.vmem (!%p660_p2), [#allocation2], %s353_s25 }
  0x36   : > { %524 = dma.done.wait (%p611_p6), %s160_s27, 128  }
  0x37   : > { %526 = vsyncadd (%p611_p6), %s160_s27, 4294967168  ;;  %s170_s4 = scalar_lea.sflag [#allocation6], %s682_s23  ;;  %s173_s30 = scalar_lea.vmem [#allocation5], %s353_s25 }
  0x38   : > { %528 = dma.done.wait (%p611_p6), %s170_s4, 128  }
  0x39   : > { %530 = vsyncadd (%p611_p6), %s170_s4, 4294967168  ;;  %s360_s26 = smul.u32 24, %s682_s23  ;;  %v200_v0 = vld [vmem:[%s163_s28] sm:$0xff]  ;;  %v201_v1 = vld [vmem:[%s173_s30] sm:$0xff]  ;;  %s499_s24 = scalar_lea.hbm %s737_s2, 48 }
  0x3a   : > { %v204_v2 = vand.u32 2147483647, %v200_v0  ;;  %v202_v9 = vsub.f32 0.0, %v200_v0  ;;  %s361_s20 = smul.u32 24, %s589_s13  ;;  %v218_v17 = vsub.f32 1.0, %v201_v1  ;;  %s234_s13 = scalar_lea.sflag [#allocation4], %s682_s23 }
  0x3b   : > { %s696_s6 = scalar_lea.vmem [#allocation7], %s360_s26 }
  0x3c   : > { %356 = vst [vmem:[%s696_s6 + $0x10] sm:$0xff] %v201_v1  ;;  %v205_v3 = vsub.f32 0.0, %v204_v2  ;;  %v203_v13 = vmax.f32 %v202_v9, 0.0  ;;  %s245_s14 = scalar_lea.hbm %s737_s2, %s361_s20  ;;  %s246_s16 = sshll.u32 %s696_s6, 4  ;;  %s247_s16 = int_to_ptr.vmem [resolvable:$true] %s246_s16 }
  0x3d   : > { %s248_s17 = sshll.u32 %s245_s14, 4  ;;  %s249_s17 = int_to_ptr.hbm [resolvable:$true] %s248_s17 }
  0x3e   : > { %v206_v4 = vmul.f32 1.442695, %v205_v3  ;;  %s493_s29 = sshra.s32 %s249_s17, 4  ;;  %s494_s29 = int_to_ptr.hbm [resolvable:$true] %s493_s29 }
  0x3f   : > { %s495_s3 = scalar_lea.hbm %s494_s29, 24  ;;  %p500_p10 = scmp.lt.s32.totalorder %s494_s29, %s737_s2 }
  0x40   : > { %415 = vpow2.f32 %v206_v4  ;;  %p496_p6 = scmp.ne.s32.totalorder %s494_s29, %s495_s3  ;;  %p501_p2 = scmp.lt.s32.totalorder %s499_s24, %s495_s3 }
  0x42   : > { %p497_p13 = pnand %p496_p6, %p618_p11  ;;  %p502_p9 = por %p501_p2, %p500_p10 }
  0x44   : > { %p498_p3 = pneg %p497_p13 }
  0x46   : > { %v416_v5 = vpop.eup %415  ;;  %p503_p0 = pnand %p502_p9, %p498_p3 }
  0x47   : > { %v208_v6 = vadd.f32 1.0, %v416_v5  ;;  %v211_v7 = vmul.f32 -0.5, %v416_v5  ;;  %v214_v10 = vand.u32 2147483647, %v416_v5 }
  0x49   : > { %417 = vlog2.f32 %v208_v6  ;;  %v212_v8 = vadd.f32 1.0, %v211_v7  ;;  %vm215_vm0 = vcmp.lt.f32.partialorder %v214_v10, 0.0004427343 }
  0x4b   : > { %v213_v11 = vmul.f32 %v416_v5, %v212_v8 }
  0x4f   : > { %v418_v12 = vpop.eup %417 }
  0x50   : > { %v210_v14 = vmul.f32 0.6931472, %v418_v12 }
  0x52   : > { %v216_v15 = vsel %vm215_vm0, %v213_v11, %v210_v14 }
  0x53   : > { %v217_v16 = vadd.f32 %v216_v15, %v203_v13 }
  0x55   : > { %v219_v18 = vadd.f32 %v217_v16, %v200_v0  ;;  %v223_v19 = vmul.f32 %v217_v16, %v201_v1 }
  0x57   : > { %v220_v20 = vmul.f32 %v219_v18, %v218_v17  ;;  %355 = vst [vmem:[%s696_s6 + $0x8] sm:$0xff] %v223_v19 }
  0x59   : > { %228 = vst [vmem:[%s696_s6] sm:$0xff] %v220_v20 }
  0x5a   : > { %506 = shalt.err (!%p503_p0)
}
  0x5b   : > { %s551_s23 = smov 128   ;;  %s552_s28 = smov 8  }
  0x5c   : > { %366 = dma.vmem_to_hbm [thread:$0]  (%p618_p11), %s247_s16, 384, %s249_s17, %s234_s13, %s551_s23, %s551_s23, %s552_s28  }
  0x5d PF: > { %s263_s4 = sand.u32 1, %s537_s9   ;;  %p744_p1 = scmp.ge.s32.totalorder %s549_s12, 2 }
  0x5e   : > { %s264_s30 = scalar_lea.sflag [#allocation4], %s263_s4 }
  0x5f   : > { %p376_p4 = pnand %p744_p1, %p622_p12 }
  0x61   : > { %p377_p7 = pneg %p376_p4 }
  0x63   : > { %532 = dma.done.wait (%p377_p7), %s264_s30, 384  }
  0x64   : > { %534 = vsyncadd (%p377_p7), %s264_s30, 4294966912  ;;  %p18_p5 = scmp.ge.s32.totalorder %s593_s15, 4   ;;  %s745_s9 = smov %s541_s10 }
  0x65   : > { %s746_s10 = smov %s545_s11  ;;  %s747_s11 = smov %s605_s18 }
  0x66   : > { %s748_s12 = smov %s593_s15  ;;  %20 = sbr.rel (!%p18_p5) target bundleno = 7 (0x7), region = 88 }
  0x6b   :  { %270 = vsyncpa [#allocation3], 1 }
  0x6c   :  { %272 = vsyncpa [#allocation3 + $0x1], 1 }
  0x6d   :  { %273 = vsyncpa [#allocation6], 1 }
  0x6e   :  { %275 = vsyncpa [#allocation6 + $0x1], 1 }
  0x6f   :  { %276 = vsyncpa [#allocation4], 1 }
  0x70   :  { %278 = vsyncpa [#allocation4 + $0x1], 1 }

</bundles_post_ra>
